<compile_context>
chip_gen: v5e
topology: v5e:2x2
jax: 0.10.0
libtpu: 0.0.40
codegen_flags: <defaults>
</compile_context>

<pallas_src>
import jax
import jax.numpy as jnp
from jax import lax
from jax.experimental import pallas as pl
from jax.experimental.pallas import tpu as pltpu


# ---------------------------------------------------------------------------
# Fused kernel:   out[b] = sum_r  U[uIdx[b], r] * I[iIdx[b], r] * T[tIdx[b], r]
# ---------------------------------------------------------------------------
def _fused_cp_kernel(
    u_idx_ref, i_idx_ref, t_idx_ref,      # VMEM: (1, block_b) int32, blocked per step
    u_tab_ref, i_tab_ref, t_tab_ref,      # VMEM: (N, R) tables, resident (const index_map)
    o_ref,                                # VMEM: (1, block_b) f32, lane-dense output row
):
    block_b = o_ref.shape[-1]

    def gather_t(idx_ref, tab_ref):
        # One-hot MXU gather in transposed layout:
        #   onehot[n, b] = (n == idx[b])                      (N, block_b)
        #   out[r, b]    = sum_n tab[n, r] * onehot[n, b]     (R, block_b)
        # Rank lands on sublanes, batch on lanes -> the final rank reduction is
        # a single cheap sublane reduce producing the lane-dense output row.
        idx = idx_ref[...]                                               # (1, block_b)
        n = tab_ref.shape[0]
        rows = lax.broadcasted_iota(jnp.int32, (n, block_b), 0)          # (N, block_b)
        onehot = (rows == idx).astype(tab_ref.dtype)                     # (N, block_b)
        return lax.dot_general(
            tab_ref[...], onehot,
            dimension_numbers=(((0,), (0,)), ((), ())),                  # contract vocab dim
            preferred_element_type=jnp.float32,
        )                                                                # (R, block_b) f32

    u = gather_t(u_idx_ref, u_tab_ref)
    i = gather_t(i_idx_ref, i_tab_ref)
    t = gather_t(t_idx_ref, t_tab_ref)

    prod = u * i * t                                                     # (R, block_b) f32
    # Sublane (rank) reduce -> lane-dense (1, block_b) row, unmasked stores.
    o_ref[...] = jnp.sum(prod, axis=0, keepdims=True).astype(o_ref.dtype)


def meta_tc_forward_pallas(u_idx, i_idx, t_idx, user_tab, item_tab, time_tab,
                           *, block_b=256, single_buffer_tables=False):
    """Fused gather + CP score.  Returns [B] float32 scores."""
    B = u_idx.shape[0]
    R = user_tab.shape[1]
    assert item_tab.shape[1] == R and time_tab.shape[1] == R
    # Multiple of 128 => lane-dense unmasked output stores; 256 fills the
    # 256-wide v6e/v7x MXU (v5e's 128x128 MXUs are already full at 128).
    assert block_b % 128 == 0 and 128 <= block_b <= 1024

    num_blocks = pl.cdiv(B, block_b)
    b_pad = num_blocks * block_b

    def _prep_idx(idx):
        idx = idx.astype(jnp.int32)
        if b_pad != B:
            idx = jnp.pad(idx, (0, b_pad - B))   # pad with valid index 0; trimmed below
        return idx.reshape(1, b_pad)             # 2D so each block is a lane-major row

    u_idx_p = _prep_idx(u_idx)
    i_idx_p = _prep_idx(i_idx)
    t_idx_p = _prep_idx(t_idx)

    # ---- VMEM budget (explicit: v5e scoped default is 16 MiB, v7x physical is
    # 64 MiB per TC, and with ("parallel",) each v7x TC holds its own tables).
    itemsize = jnp.dtype(user_tab.dtype).itemsize
    tab_bytes = int(user_tab.size + item_tab.size + time_tab.size) * itemsize
    n_tab_buf = 1 if single_buffer_tables else 2   # auto-pipeline double-buffers by default
    vocab_total = user_tab.shape[0] + item_tab.shape[0] + time_tab.shape[0]
    per_step_bytes = (vocab_total * block_b * itemsize      # one-hot operands
                      + 3 * R * block_b * 4                 # gathered (R, block_b) f32
                      + 3 * 2 * block_b * 4                 # double-buffered idx blocks
                      + 2 * block_b * 4)                    # double-buffered output rows
    vmem_limit = int(min(max(n_tab_buf * tab_bytes + per_step_bytes + (4 << 20),
                             32 << 20),
                         110 << 20))

    def _table_spec(shape):
        if single_buffer_tables:
            # Constant index_map => the block never changes; single-buffering
            # halves the resident-table footprint (v7x / v5e VMEM headroom).
            return pl.BlockSpec(shape, lambda b: (0, 0), pipeline_mode=pl.Buffered(1))
        return pl.BlockSpec(shape, lambda b: (0, 0))

    out = pl.pallas_call(
        _fused_cp_kernel,
        out_shape=jax.ShapeDtypeStruct((num_blocks, 1, block_b), jnp.float32),
        grid_spec=pltpu.PrefetchScalarGridSpec(
            num_scalar_prefetch=0,
            grid=(num_blocks,),
            in_specs=[
                pl.BlockSpec((1, block_b), lambda b: (0, b)),   # uIdx block
                pl.BlockSpec((1, block_b), lambda b: (0, b)),   # iIdx block
                pl.BlockSpec((1, block_b), lambda b: (0, b)),   # tIdx block
                _table_spec(user_tab.shape),                    # resident tables
                _table_spec(item_tab.shape),
                _table_spec(time_tab.shape),
            ],
            out_specs=pl.BlockSpec((None, 1, block_b), lambda b: (b, 0, 0)),
        ),
        compiler_params=pltpu.CompilerParams(
            dimension_semantics=("parallel",),   # shard batch blocks across TCs (v7x)
            vmem_limit_bytes=vmem_limit,
        ),
    )(u_idx_p, i_idx_p, t_idx_p, user_tab, item_tab, time_tab)

    return out.reshape(b_pad)[:B]


# ---------------------------------------------------------------------------
# MetaTC-equivalent module (parameters + forward), JAX side
# ---------------------------------------------------------------------------
class MetaTCJax:
    def __init__(self, num_users, num_items, num_times, rank, key):
        ku, ki, kt = jax.random.split(key, 3)
        # torch.nn.Embedding default init: N(0, 1).  Stored f32 to match torch;
        # bf16 storage also works with the kernel (f32 accumulate in-kernel).
        self.user_embeds = jax.random.normal(ku, (num_users, rank), jnp.float32)
        self.item_embeds = jax.random.normal(ki, (num_items, rank), jnp.float32)
        self.time_embeds = jax.random.normal(kt, (num_times, rank), jnp.float32)
        self.rank = rank

    def get_embeddings(self, idx, select):
        table = {
            "user": self.user_embeds,
            "item": self.item_embeds,
            "time": self.time_embeds,
        }[select]
        return jnp.take(table, idx, axis=0)

    def get_score(self, user_embeds, item_embeds, time_embeds):
        # Fallback on already-gathered embeddings (plain jnp); production
        # forward() uses the fused Pallas kernel.
        return jnp.sum(user_embeds * item_embeds * time_embeds, axis=-1)

    def forward(self, uIdx, iIdx, tIdx):
        return meta_tc_forward_pallas(
            uIdx, iIdx, tIdx,
            self.user_embeds, self.item_embeds, self.time_embeds,
        )


# ---------------------------------------------------------------------------
# Reference (pure jnp) for correctness checking
# ---------------------------------------------------------------------------
def reference_forward(model, uIdx, iIdx, tIdx):
    u = jnp.take(model.user_embeds, uIdx, axis=0)
    i = jnp.take(model.item_embeds, iIdx, axis=0)
    t = jnp.take(model.time_embeds, tIdx, axis=0)
    return jnp.sum(u * i * t, axis=-1)


if __name__ == "__main__":
    # Small, MetaTC-consistent shapes.  batch is deliberately NOT a multiple of
    # block_b (exercises the pad/trim path) and spans 3 grid steps.
    num_users, num_items, num_times = 64, 64, 32
    rank = 32
    batch = 600

    key = jax.random.PRNGKey(0)
    k_model, k_u, k_i, k_t = jax.random.split(key, 4)

    model = MetaTCJax(num_users, num_items, num_times, rank, k_model)

    uIdx = jax.random.randint(k_u, (batch,), 0, num_users, dtype=jnp.int32)
    iIdx = jax.random.randint(k_i, (batch,), 0, num_items, dtype=jnp.int32)
    tIdx = jax.random.randint(k_t, (batch,), 0, num_times, dtype=jnp.int32)

    preds = jax.block_until_ready(model.forward(uIdx, iIdx, tIdx))
    ref = reference_forward(model, uIdx, iIdx, tIdx)

    assert preds.shape == (batch,), preds.shape
    # Tolerance covers MXU f32 multi-pass rounding in the one-hot gather while
    # still catching any real indexing / reduction bug (those produce O(1) errors).
    assert jnp.allclose(preds, ref, atol=1e-2, rtol=1e-2), \
        float(jnp.max(jnp.abs(preds - ref)))

    print("KERNEL_OK")
</pallas_src>

<mosaic_0001>
module attributes {stable_mosaic.version = 11 : i64} {
  func.func @_fused_cp_kernel(%arg0: i32, %arg1: memref<1x256xi32, #tpu.memory_space<vmem>>, %arg2: memref<1x256xi32, #tpu.memory_space<vmem>>, %arg3: memref<1x256xi32, #tpu.memory_space<vmem>>, %arg4: memref<64x32xf32, #tpu.memory_space<vmem>>, %arg5: memref<64x32xf32, #tpu.memory_space<vmem>>, %arg6: memref<32x32xf32, #tpu.memory_space<vmem>>, %arg7: memref<1x1x256xf32, #tpu.memory_space<vmem>>) attributes {dimension_semantics = [#tpu.dimension_semantics<parallel>], iteration_bounds = array<i64: 3>, scalar_prefetch = 0 : i64, scratch_operands = 0 : i64, tpu.core_type = #tpu.core_type<tc>, window_params = [{transform_indices = @transform_0, window_bounds = array<i64: 1, 256>}, {transform_indices = @transform_1, window_bounds = array<i64: 1, 256>}, {transform_indices = @transform_2, window_bounds = array<i64: 1, 256>}, {pipeline_mode = #tpu.pipeline_mode<synchronous>, transform_indices = @transform_3, window_bounds = array<i64: 64, 32>}, {pipeline_mode = #tpu.pipeline_mode<synchronous>, transform_indices = @transform_4, window_bounds = array<i64: 64, 32>}, {pipeline_mode = #tpu.pipeline_mode<synchronous>, transform_indices = @transform_5, window_bounds = array<i64: 32, 32>}, {transform_indices = @transform_6, window_bounds = array<i64: 1, 1, 256>}]} {
    %c0 = arith.constant 0 : index
    %c0_0 = arith.constant 0 : index
    %0 = vector.load %arg1[%c0, %c0_0] : memref<1x256xi32, #tpu.memory_space<vmem>>, vector<1x256xi32>
    %1 = tpu.iota {dimensions = array<i32: 0>} : vector<64x256xi32>
    %2 = vector.broadcast %0 : vector<1x256xi32> to vector<64x256xi32>
    %3 = arith.cmpi eq, %1, %2 : vector<64x256xi32>
    %4 = arith.extui %3 : vector<64x256xi1> to vector<64x256xi32>
    %5 = arith.sitofp %4 : vector<64x256xi32> to vector<64x256xf32>
    %c0_1 = arith.constant 0 : index
    %c0_2 = arith.constant 0 : index
    %6 = vector.load %arg4[%c0_1, %c0_2] : memref<64x32xf32, #tpu.memory_space<vmem>>, vector<64x32xf32>
    %cst = arith.constant dense<0.000000e+00> : vector<32x256xf32>
    %7 = tpu.matmul %6, %5, %cst {dimension_numbers = #tpu.dot_dimension_numbers<[0], [0], [1], [1], [0, 1, 1, 1], [], []>} : vector<64x32xf32>, vector<64x256xf32>, vector<32x256xf32> -> vector<32x256xf32>
    %c0_3 = arith.constant 0 : index
    %c0_4 = arith.constant 0 : index
    %8 = vector.load %arg2[%c0_3, %c0_4] : memref<1x256xi32, #tpu.memory_space<vmem>>, vector<1x256xi32>
    %9 = tpu.iota {dimensions = array<i32: 0>} : vector<64x256xi32>
    %10 = vector.broadcast %8 : vector<1x256xi32> to vector<64x256xi32>
    %11 = arith.cmpi eq, %9, %10 : vector<64x256xi32>
    %12 = arith.extui %11 : vector<64x256xi1> to vector<64x256xi32>
    %13 = arith.sitofp %12 : vector<64x256xi32> to vector<64x256xf32>
    %c0_5 = arith.constant 0 : index
    %c0_6 = arith.constant 0 : index
    %14 = vector.load %arg5[%c0_5, %c0_6] : memref<64x32xf32, #tpu.memory_space<vmem>>, vector<64x32xf32>
    %cst_7 = arith.constant dense<0.000000e+00> : vector<32x256xf32>
    %15 = tpu.matmul %14, %13, %cst_7 {dimension_numbers = #tpu.dot_dimension_numbers<[0], [0], [1], [1], [0, 1, 1, 1], [], []>} : vector<64x32xf32>, vector<64x256xf32>, vector<32x256xf32> -> vector<32x256xf32>
    %c0_8 = arith.constant 0 : index
    %c0_9 = arith.constant 0 : index
    %16 = vector.load %arg3[%c0_8, %c0_9] : memref<1x256xi32, #tpu.memory_space<vmem>>, vector<1x256xi32>
    %17 = tpu.iota {dimensions = array<i32: 0>} : vector<32x256xi32>
    %18 = vector.broadcast %16 : vector<1x256xi32> to vector<32x256xi32>
    %19 = arith.cmpi eq, %17, %18 : vector<32x256xi32>
    %20 = arith.extui %19 : vector<32x256xi1> to vector<32x256xi32>
    %21 = arith.sitofp %20 : vector<32x256xi32> to vector<32x256xf32>
    %c0_10 = arith.constant 0 : index
    %c0_11 = arith.constant 0 : index
    %22 = vector.load %arg6[%c0_10, %c0_11] : memref<32x32xf32, #tpu.memory_space<vmem>>, vector<32x32xf32>
    %cst_12 = arith.constant dense<0.000000e+00> : vector<32x256xf32>
    %23 = tpu.matmul %22, %21, %cst_12 {dimension_numbers = #tpu.dot_dimension_numbers<[0], [0], [1], [1], [0, 1, 1, 1], [], []>} : vector<32x32xf32>, vector<32x256xf32>, vector<32x256xf32> -> vector<32x256xf32>
    %24 = arith.mulf %7, %15 : vector<32x256xf32>
    %25 = arith.mulf %24, %23 : vector<32x256xf32>
    %cst_13 = arith.constant dense<0.000000e+00> : vector<256xf32>
    %26 = vector.multi_reduction <add>, %25, %cst_13 [0] : vector<32x256xf32> to vector<256xf32>
    %27 = vector.shape_cast %26 : vector<256xf32> to vector<1x256xf32>
    %c0_14 = arith.constant 0 : index
    %c0_15 = arith.constant 0 : index
    %c0_16 = arith.constant 0 : index
    %28 = vector.load %arg7[%c0_14, %c0_15, %c0_16] : memref<1x1x256xf32, #tpu.memory_space<vmem>>, vector<1x1x256xf32>
    %29 = vector.shape_cast %28 : vector<1x1x256xf32> to vector<1x256xf32>
    %30 = vector.shape_cast %27 : vector<1x256xf32> to vector<1x1x256xf32>
    tpu.vector_store %arg7[%c0_14, %c0_15, %c0_16], %30 {strides = array<i32>} : memref<1x1x256xf32, #tpu.memory_space<vmem>>, vector<1x1x256xf32>,
    return
  }
  func.func @transform_0(%arg0: i32) -> (i32, i32) {
    %c0_i32 = arith.constant 0 : i32
    %c0_i32_0 = arith.constant 0 : i32
    return %c0_i32, %arg0 : i32, i32
  }
  func.func @transform_1(%arg0: i32) -> (i32, i32) {
    %c0_i32 = arith.constant 0 : i32
    %c0_i32_0 = arith.constant 0 : i32
    return %c0_i32, %arg0 : i32, i32
  }
  func.func @transform_2(%arg0: i32) -> (i32, i32) {
    %c0_i32 = arith.constant 0 : i32
    %c0_i32_0 = arith.constant 0 : i32
    return %c0_i32, %arg0 : i32, i32
  }
  func.func @transform_3(%arg0: i32) -> (i32, i32) {
    %c0_i32 = arith.constant 0 : i32
    %c0_i32_0 = arith.constant 0 : i32
    %c0_i32_1 = arith.constant 0 : i32
    return %c0_i32, %c0_i32_0 : i32, i32
  }
  func.func @transform_4(%arg0: i32) -> (i32, i32) {
    %c0_i32 = arith.constant 0 : i32
    %c0_i32_0 = arith.constant 0 : i32
    %c0_i32_1 = arith.constant 0 : i32
    return %c0_i32, %c0_i32_0 : i32, i32
  }
  func.func @transform_5(%arg0: i32) -> (i32, i32) {
    %c0_i32 = arith.constant 0 : i32
    %c0_i32_0 = arith.constant 0 : i32
    %c0_i32_1 = arith.constant 0 : i32
    return %c0_i32, %c0_i32_0 : i32, i32
  }
  func.func @transform_6(%arg0: i32) -> (i32, i32, i32) {
    %c0_i32 = arith.constant 0 : i32
    %c0_i32_0 = arith.constant 0 : i32
    %c0_i32_1 = arith.constant 0 : i32
    return %arg0, %c0_i32, %c0_i32_0 : i32, i32, i32
  }
}

</mosaic_0001>

<bundles_post_ra>
// kernel: tpu_custom_call.1
= control target key start
LH: loop header
LB: loop body
LE: loop exit
PB: predicated region body
PF: predicated region fallthrough
CT: control target
= control target key end

     0   :  { %11 = vsyncpa [#allocation3], 0  ;;  %s1559_s0 = inlined_call_operand.vmem [shape: s32[1,768], index: 0, kind: input, shape index: {}]   ;;  %s1560_s1 = inlined_call_operand.vmem [shape: s32[1,768], index: 1, kind: input, shape index: {}]   ;;  %s1561_s2 = inlined_call_operand.vmem [shape: s32[1,768], index: 2, kind: input, shape index: {}]   ;;  %s1562_s3 = inlined_call_operand.vmem [shape: f32[64,32], index: 3, kind: input, shape index: {}]   ;;  %s1563_s4 = inlined_call_operand.vmem [shape: f32[64,32], index: 4, kind: input, shape index: {}]   ;;  %s1564_s5 = inlined_call_operand.vmem [shape: f32[32,32], index: 5, kind: input, shape index: {}]   ;;  %s1565_s6 = inlined_call_operand.hbm [shape: f32[3,1,256], index: 6, kind: output, shape index: {}]  }
   0x1   :  { %13 = vsyncpa [#allocation3 + $0x1], 0  ;;  %s1161_s21 = smov 0   ;;  %s1163_s22 = smov 0  }
   0x2   :  { %s1165_s23 = smov 0   ;;  %s1167_s24 = smov 0  }
   0x3 LB: > { %s887_s25 = sadd.s32 4294967295, %s1123_s24   ;;  %s888_s26 = sadd.s32 4294967294, %s1123_s24   ;;  %s1123_s24 = sphi %s1167_s24, %s1571_s24   ;;  %s1119_s23 = sphi %s1165_s23, %s1570_s23   ;;  %s1115_s22 = sphi %s1163_s22, %s1569_s22   ;;  %s1111_s21 = sphi %s1161_s21, %s1568_s21  }
   0x4   : > { %s1184_s27 = sadd.s32 1, %s1123_s24   ;;  %s167_s28 = sadd.s32 1, %s1119_s23 }
   0x5   : > { %s164_s29 = ssub.s32 %s1123_s24, %s1184_s27  ;;  %p177_p0 = scmp.ne.s32.totalorder %s1119_s23, %s1115_s22 }
   0x6   : > { %p165_p1 = scmp.eq.s32.totalorder %s164_s29, 0  ;;  %p178_p2 = scmp.eq.s32.totalorder %s887_s25, 2 }
   0x7   : > { %p183_p3 = scmp.ne.s32.totalorder %s1115_s22, %s1111_s21  ;;  %p184_p4 = scmp.eq.s32.totalorder %s888_s26, 2 }
   0x8   : > { %s1194_s30 = scalar_select %p165_p1, %s1119_s23, %s167_s28  }
   0x9   : > { %p1196_p5 = por %p178_p2, %p177_p0  ;;  %p1200_p6 = por %p184_p4, %p183_p3 }
   0xa   : > { %p891_p7 = scmp.ge.s32.totalorder %s1123_s24, 1  ;;  %p235_p8 = scmp.lt.s32.totalorder %s1123_s24, 4 }
   0xc   : > { %p236_p9 = pnand %p891_p7, %p235_p8 }
   0xd   : > { %s1218_s17 = sshll.u32 (!%p236_p9), %s887_s25, 1  ;;  %s1081_s13 = scalar_lea.hbm (!%p236_p9), %s1565_s6, 6 }
   0xe   : > { %239 = sbr.rel (%p236_p9) target bundleno = 397 (0x18d), region = 44  ;;  %p273_p10 = scmp.lt.s32.totalorder (!%p236_p9), %s1218_s17, 5 }
   0xf   : > { %s809_s20 = scalar_lea.hbm (!%p236_p9), %s1565_s6, %s1218_s17 }
  0x10   : > { %s813_s29 = sshll.u32 (!%p236_p9), %s809_s20, 4  ;;  %s814_s29 = int_to_ptr.hbm [resolvable:$true] %s813_s29 }
  0x11   : > { %s1075_s10 = sshra.s32 (!%p236_p9), %s814_s29, 4  ;;  %s1076_s10 = int_to_ptr.hbm [resolvable:$true] %s1075_s10 }
  0x12   : > { %p1082_p0 = scmp.lt.s32.totalorder (!%p236_p9), %s1076_s10, %s1565_s6 }
  0x13   : > { %v347_v0 = vld [vmem:[%s1562_s3] sm:$0xff]  ;;  %v348_v2 = vld [vmem:[%s1562_s3 + $0x8] sm:$0xff]  ;;  %v349_v4 = vld [vmem:[%s1562_s3 + $0x10] sm:$0xff]  ;;  %s1231_s25 = scalar_select %p273_p10, %s1218_s17, 5  ;;  %v288_v10 = vlaneseq  ;;  %v1125_v22 = vmov 1.0  }
  0x14   : > { %355 = vxpose.xlu0.b32.start [1/8] (short) (narrow) %v347_v0, 32  ;;  %v509_v1 = vld [vmem:[%s1563_s4] sm:$0xff]  ;;  %v510_v3 = vld [vmem:[%s1563_s4 + $0x8] sm:$0xff]  ;;  %v511_v5 = vld [vmem:[%s1563_s4 + $0x10] sm:$0xff]  ;;  %s1077_s17 = scalar_lea.hbm %s1076_s10, 2 }
  0x15   : > { %517 = vxpose.xlu1.b32.start [1/8] (short) (narrow) %v509_v1, 32  ;;  %v646_v6 = vld [vmem:[%s1564_s5] sm:$0xff]  ;;  %v350_v7 = vld [vmem:[%s1562_s3 + $0x18] sm:$0xff]  ;;  %s275_s15 = scalar_lea.vmem %s1559_s0, %s1231_s25  ;;  %v647_v9 = vld [vmem:[%s1564_s5 + $0x8] sm:$0xff]  ;;  %v1247_v12 = vshrl.u32 %v288_v10, 7  ;;  %s280_s12 = scalar_lea.vmem %s1560_s1, %s1231_s25 }
  0x16   : > { %650 = vxpose.xlu2.b32.start [1/4] (short) (narrow) %v646_v6, 32  ;;  %v512_v8 = vld [vmem:[%s1563_s4 + $0x18] sm:$0xff]  ;;  %v287_v11 = vld [vmem:[%s275_s15] sm:$0x3]  ;;  %v648_v20 = vld [vmem:[%s1564_s5 + $0x10] sm:$0xff]  ;;  %s285_s15 = scalar_lea.vmem %s1561_s2, %s1231_s25  ;;  %s269_s25 = sand.u32 1, %s1115_s22  }
  0x17   : > { %v1249_v13 = vperm.slane %v287_v11, 0  ;;  %v1251_v14 = vperm.slane %v287_v11, 1  ;;  %v351_v15 = vld [vmem:[%s1562_s3 + $0x20] sm:$0xff]  ;;  %v1257_v16 = vadd.s32 56, %v1247_v12  ;;  %v1260_v17 = vadd.s32 48, %v1247_v12  ;;  %v352_v24 = vld [vmem:[%s1562_s3 + $0x28] sm:$0xff]  ;;  %p1078_p11 = scmp.ne.s32.totalorder %s1076_s10, %s1077_s17  ;;  %p1083_p1 = scmp.lt.s32.totalorder %s1081_s13, %s1077_s17 }
  0x18   : > { %v1263_v18 = vadd.s32 40, %v1247_v12  ;;  %v513_v19 = vld [vmem:[%s1563_s4 + $0x20] sm:$0xff]  ;;  %v1278_v21 = vadd.s32 32, %v1247_v12  ;;  %v1301_v23 = vadd.s32 24, %v1247_v12  ;;  %v1322_v25 = vadd.s32 16, %v1247_v12  ;;  %v514_v26 = vld [vmem:[%s1563_s4 + $0x28] sm:$0xff] }
  0x19   : > { %vm313_vm0 = vcmp.eq.s32.totalorder %v1257_v16, %v1249_v13  ;;  %vm314_vm1 = vcmp.eq.s32.totalorder %v1257_v16, %v1251_v14  ;;  %vm311_vm2 = vcmp.eq.s32.totalorder %v1260_v17, %v1249_v13  ;;  %vm312_vm3 = vcmp.eq.s32.totalorder %v1260_v17, %v1251_v14  ;;  %v649_v27 = vld [vmem:[%s1564_s5 + $0x18] sm:$0xff]  ;;  %v353_v29 = vld [vmem:[%s1562_s3 + $0x30] sm:$0xff]  ;;  %v458_v33 = vld [vmem:[%s280_s12] sm:$0x3]  ;;  %s892_s16 = sshll.u32 %s269_s25, 1  ;;  %s799_s9 = scalar_lea.sflag [#allocation3], %s269_s25 }
  0x1a   : > { %912 = vmatpush.msk.msra.mxu0 %vm313_vm0, %v1125_v22  ;;  %vm309_vm4 = vcmp.eq.s32.totalorder %v1263_v18, %v1249_v13  ;;  %924 = vmatpush.msk.msra.mxu1 %vm314_vm1, %v1125_v22  ;;  %vm310_vm5 = vcmp.eq.s32.totalorder %v1263_v18, %v1251_v14  ;;  %vm307_vm6 = vcmp.eq.s32.totalorder %v1278_v21, %v1249_v13  ;;  %v1348_v28 = vadd.s32 8, %v1247_v12  ;;  %v515_v30 = vld [vmem:[%s1563_s4 + $0x30] sm:$0xff]  ;;  %v354_v31 = vld [vmem:[%s1562_s3 + $0x38] sm:$0xff]  ;;  %v619_v36 = vld [vmem:[%s285_s15] sm:$0x3]  ;;  %s271_s26 = scalar_lea.vmem [#allocation2], %s892_s16  ;;  %p1079_p12 = pnand %p1078_p11, %p1196_p5 }
  0x1b   : > { %1004 = vmatpush.msk.msra.mxu2 %vm313_vm0, %v1125_v22  ;;  %1012 = vmatpush.msk.msra.mxu3 %vm314_vm1, %v1125_v22  ;;  %vm308_vm7 = vcmp.eq.s32.totalorder %v1278_v21, %v1251_v14  ;;  %vm305_vm8 = vcmp.eq.s32.totalorder %v1301_v23, %v1249_v13  ;;  %vm306_vm9 = vcmp.eq.s32.totalorder %v1301_v23, %v1251_v14  ;;  %v516_v32 = vld [vmem:[%s1563_s4 + $0x38] sm:$0xff]  ;;  %v460_v34 = vperm.slane %v458_v33, 1  ;;  %s811_s28 = sshll.u32 %s271_s26, 4  ;;  %p1084_p2 = por %p1083_p1, %p1082_p0  ;;  %s812_s28 = int_to_ptr.vmem [resolvable:$true] %s811_s28 }
  0x1c   : > { %356 = vxpose.xlu0.b32.cont [2/8] (short) (narrow) %v348_v2, 32  ;;  %913 = vmatpush.msk.msra.mxu0 %vm311_vm2, %v1125_v22  ;;  %vm303_vm10 = vcmp.eq.s32.totalorder %v1322_v25, %v1249_v13  ;;  %vm304_vm11 = vcmp.eq.s32.totalorder %v1322_v25, %v1251_v14  ;;  %vm301_vm12 = vcmp.eq.s32.totalorder %v1348_v28, %v1249_v13  ;;  %v459_v35 = vperm.slane %v458_v33, 0  ;;  %p1080_p13 = pneg %p1079_p12 }
  0x1d   : > { %518 = vxpose.xlu1.b32.cont [2/8] (short) (narrow) %v510_v3, 32  ;;  %925 = vmatpush.msk.msra.mxu1 %vm312_vm3, %v1125_v22  ;;  %vm302_vm13 = vcmp.eq.s32.totalorder %v1348_v28, %v1251_v14  ;;  %vm299_vm14 = vcmp.eq.s32.totalorder %v1247_v12, %v1249_v13  ;;  %vm300_vm15 = vcmp.eq.s32.totalorder %v1247_v12, %v1251_v14  ;;  %v621_v37 = vperm.slane %v619_v36, 1 }
  0x1e   : > { %651 = vxpose.xlu2.b32.cont [2/4] (short) (narrow) %v647_v9, 32  ;;  %914 = vmatpush.msk.msra.mxu0 %vm309_vm4, %v1125_v22  ;;  %vm476_vm0 = vcmp.eq.s32.totalorder %v1257_v16, %v460_v34  ;;  %vm475_vm1 = vcmp.eq.s32.totalorder %v1257_v16, %v459_v35  ;;  %v620_v38 = vperm.slane %v619_v36, 0  ;;  %p1085_p3 = pnand %p1084_p2, %p1080_p13 }
  0x1f   : > { %1005 = vmatpush.msk.msra.mxu2 %vm311_vm2, %v1125_v22  ;;  %1013 = vmatpush.msk.msra.mxu3 %vm312_vm3, %v1125_v22  ;;  %vm474_vm2 = vcmp.eq.s32.totalorder %v1260_v17, %v460_v34  ;;  %vm473_vm3 = vcmp.eq.s32.totalorder %v1260_v17, %v459_v35 }
  0x20   : > { %926 = vmatpush.msk.msra.mxu1 %vm310_vm5, %v1125_v22  ;;  %915 = vmatpush.msk.msra.mxu0 %vm307_vm6, %v1125_v22 }
  0x21   : > { %1006 = vmatpush.msk.msra.mxu2 %vm309_vm4, %v1125_v22  ;;  %1014 = vmatpush.msk.msra.mxu3 %vm310_vm5, %v1125_v22  ;;  %vm472_vm4 = vcmp.eq.s32.totalorder %v1263_v18, %v460_v34  ;;  %vm471_vm5 = vcmp.eq.s32.totalorder %v1263_v18, %v459_v35 }
  0x22   : > { %927 = vmatpush.msk.msra.mxu1 %vm308_vm7, %v1125_v22  ;;  %916 = vmatpush.msk.msra.mxu0 %vm305_vm8, %v1125_v22 }
  0x23   : > { %1007 = vmatpush.msk.msra.mxu2 %vm307_vm6, %v1125_v22  ;;  %1015 = vmatpush.msk.msra.mxu3 %vm308_vm7, %v1125_v22  ;;  %vm470_vm6 = vcmp.eq.s32.totalorder %v1278_v21, %v460_v34  ;;  %vm469_vm7 = vcmp.eq.s32.totalorder %v1278_v21, %v459_v35 }
  0x24   : > { %357 = vxpose.xlu0.b32.cont [3/8] (short) (narrow) %v349_v4, 32  ;;  %928 = vmatpush.msk.msra.mxu1 %vm306_vm9, %v1125_v22 }
  0x25   : > { %519 = vxpose.xlu1.b32.cont [3/8] (short) (narrow) %v511_v5, 32  ;;  %917 = vmatpush.msk.msra.mxu0 %vm303_vm10, %v1125_v22 }
  0x26   : > { %652 = vxpose.xlu2.b32.cont [3/4] (short) (narrow) %v648_v20, 32  ;;  %929 = vmatpush.msk.msra.mxu1 %vm304_vm11, %v1125_v22 }
  0x27   : > { %1008 = vmatpush.msk.msra.mxu2 %vm305_vm8, %v1125_v22  ;;  %1016 = vmatpush.msk.msra.mxu3 %vm306_vm9, %v1125_v22  ;;  %vm468_vm8 = vcmp.eq.s32.totalorder %v1301_v23, %v460_v34  ;;  %vm467_vm9 = vcmp.eq.s32.totalorder %v1301_v23, %v459_v35 }
  0x28   : > { %918 = vmatpush.msk.msra.mxu0 %vm301_vm12, %v1125_v22  ;;  %930 = vmatpush.msk.msra.mxu1 %vm302_vm13, %v1125_v22 }
  0x29   : > { %1009 = vmatpush.msk.msra.mxu2 %vm303_vm10, %v1125_v22  ;;  %1017 = vmatpush.msk.msra.mxu3 %vm304_vm11, %v1125_v22  ;;  %vm466_vm10 = vcmp.eq.s32.totalorder %v1322_v25, %v460_v34  ;;  %vm465_vm11 = vcmp.eq.s32.totalorder %v1322_v25, %v459_v35 }
  0x2a   : > { %919 = vmatpush.msk.msra.mxu0 %vm299_vm14, %v1125_v22  ;;  %931 = vmatpush.msk.msra.mxu1 %vm300_vm15, %v1125_v22 }
  0x2b   : > { %1010 = vmatpush.msk.msra.mxu2 %vm301_vm12, %v1125_v22  ;;  %1018 = vmatpush.msk.msra.mxu3 %vm302_vm13, %v1125_v22  ;;  %vm464_vm12 = vcmp.eq.s32.totalorder %v1348_v28, %v460_v34  ;;  %vm463_vm13 = vcmp.eq.s32.totalorder %v1348_v28, %v459_v35 }
  0x2c   : > { %358 = vxpose.xlu0.b32.cont [4/8] (short) (narrow) %v350_v7, 32 }
  0x2d   : > { %520 = vxpose.xlu1.b32.cont [4/8] (short) (narrow) %v512_v8, 32  ;;  %1011 = vmatpush.msk.msra.mxu2 %vm299_vm14, %v1125_v22  ;;  %vm629_vm14 = vcmp.eq.s32.totalorder %v1301_v23, %v621_v37 }
  0x2e   : > { %653 = vxpose.xlu2.b32.end [4/4] (short) (narrow) %v649_v27, 32  ;;  %1019 = vmatpush.msk.msra.mxu3 %vm300_vm15, %v1125_v22  ;;  %vm628_vm15 = vcmp.eq.s32.totalorder %v1301_v23, %v620_v38 }
  0x2f   : > { %952 = vmatpush.msk.msrb.mxu2 %vm475_vm1, %v1125_v22  ;;  %992 = vmatpush.msk.msrb.mxu1 %vm629_vm14, %v1125_v22  ;;  %vm462_vm1 = vcmp.eq.s32.totalorder %v1247_v12, %v460_v34 }
  0x30   : > { %964 = vmatpush.msk.msrb.mxu3 %vm476_vm0, %v1125_v22  ;;  %vm627_vm0 = vcmp.eq.s32.totalorder %v1322_v25, %v621_v37  ;;  %984 = vmatpush.msk.msrb.mxu0 %vm628_vm15, %v1125_v22 }
  0x31   : > { %953 = vmatpush.msk.msrb.mxu2 %vm473_vm3, %v1125_v22  ;;  %vm461_vm3 = vcmp.eq.s32.totalorder %v1247_v12, %v459_v35  ;;  %993 = vmatpush.msk.msrb.mxu1 %vm627_vm0, %v1125_v22 }
  0x32   : > { %965 = vmatpush.msk.msrb.mxu3 %vm474_vm2, %v1125_v22  ;;  %vm626_vm2 = vcmp.eq.s32.totalorder %v1322_v25, %v620_v38 }
  0x33   : > { %954 = vmatpush.msk.msrb.mxu2 %vm471_vm5, %v1125_v22  ;;  %985 = vmatpush.msk.msrb.mxu0 %vm626_vm2, %v1125_v22  ;;  %vm625_vm5 = vcmp.eq.s32.totalorder %v1348_v28, %v621_v37 }
  0x34   : > { %359 = vxpose.xlu0.b32.cont [5/8] (short) (narrow) %v351_v15, 32  ;;  %966 = vmatpush.msk.msrb.mxu3 %vm472_vm4, %v1125_v22  ;;  %vm387_vm4 = vcmask 523264  }
  0x35   : > { %521 = vxpose.xlu1.b32.cont [5/8] (short) (narrow) %v513_v19, 32  ;;  %955 = vmatpush.msk.msrb.mxu2 %vm469_vm7, %v1125_v22  ;;  %vm623_vm7 = vcmp.eq.s32.totalorder %v1247_v12, %v621_v37 }
  0x36   : > { %967 = vmatpush.msk.msrb.mxu3 %vm470_vm6, %v1125_v22  ;;  %vm624_vm6 = vcmp.eq.s32.totalorder %v1348_v28, %v620_v38  ;;  %994 = vmatpush.msk.msrb.mxu1 %vm625_vm5, %v1125_v22 }
  0x37   : > { %956 = vmatpush.msk.msrb.mxu2 %vm467_vm9, %v1125_v22  ;;  %986 = vmatpush.msk.msrb.mxu0 %vm624_vm6, %v1125_v22  ;;  %vm682_vm9 = vcmask 261120  }
  0x38   : > { %968 = vmatpush.msk.msrb.mxu3 %vm468_vm8, %v1125_v22  ;;  %vm622_vm8 = vcmp.eq.s32.totalorder %v1247_v12, %v620_v38  ;;  %995 = vmatpush.msk.msrb.mxu1 %vm623_vm7, %v1125_v22 }
  0x39   : > { %957 = vmatpush.msk.msrb.mxu2 %vm465_vm11, %v1125_v22  ;;  %987 = vmatpush.msk.msrb.mxu0 %vm622_vm8, %v1125_v22  ;;  %vm795_vm11 = vcmp.lt.s32.totalorder %v288_v10, 256 }
  0x3a   : > { %969 = vmatpush.msk.msrb.mxu3 %vm466_vm10, %v1125_v22  ;;  %vm790_vm10 = vcmask 1040384  }
  0x3b   : > { %958 = vmatpush.msk.msrb.mxu2 %vm463_vm13, %v1125_v22 }
  0x3c   : > { %360 = vxpose.xlu0.b32.cont [6/8] (short) (narrow) %v352_v24, 32  ;;  %970 = vmatpush.msk.msrb.mxu3 %vm464_vm12, %v1125_v22 }
  0x3d   : > { %522 = vxpose.xlu1.b32.cont [6/8] (short) (narrow) %v514_v26, 32  ;;  %959 = vmatpush.msk.msrb.mxu2 %vm461_vm3, %v1125_v22 }
  0x3e   : > { %971 = vmatpush.msk.msrb.mxu3 %vm462_vm1, %v1125_v22 }
  0x44   : > { %361 = vxpose.xlu0.b32.cont [7/8] (short) (narrow) %v353_v29, 32 }
  0x45   : > { %523 = vxpose.xlu1.b32.cont [7/8] (short) (narrow) %v515_v30, 32 }
  0x4c   : > { %362 = vxpose.xlu0.b32.end [8/8] (short) (narrow) %v354_v31, 32 }
  0x4d   : > { %524 = vxpose.xlu1.b32.end [8/8] (short) (narrow) %v516_v32, 32 }
  0xaf   : > { %v666_v41 = vpop.trf.xlu2 }
  0xb7   : > { %v667_v43 = vpop.trf.xlu2 }
  0xb8   : > { %v371_v39 = vpop.trf.xlu0 }
  0xb9   : > { %920 = vmatmul.msk.f32.vlgmr.msra.gmra.mxu0 %vm387_vm4, %v371_v39  ;;  %932 = vmatmul.msk.f32.vlgmr.msra.gmra.mxu1 %vm387_vm4, %v371_v39  ;;  %v533_v45 = vpop.trf.xlu1 }
  0xbf   : > { %v668_v46 = vpop.trf.xlu2 }
  0xc0   : > { %v372_v40 = vpop.trf.xlu0 }
  0xc1   : > { %921 = vmatmul.msk.f32.gmra.mxu0 %vm387_vm4, %v372_v40  ;;  %933 = vmatmul.msk.f32.gmra.mxu1 %vm387_vm4, %v372_v40  ;;  %v534_v47 = vpop.trf.xlu1 }
  0xc7   : > { %v669_v48 = vpop.trf.xlu2 }
  0xc8   : > { %v373_v42 = vpop.trf.xlu0 }
  0xc9   : > { %922 = vmatmul.msk.f32.vlgmr.msra.gmra.mxu2 %vm387_vm4, %v373_v42  ;;  %934 = vmatmul.msk.f32.vlgmr.msra.gmra.mxu3 %vm387_vm4, %v373_v42  ;;  %v535_v49 = vpop.trf.xlu1 }
  0xca   : > { %988 = vmatmul.msk.f32.vlgmr.msrb.gmra.mxu0 %vm682_vm9, %v666_v41  ;;  %996 = vmatmul.msk.f32.vlgmr.msrb.gmra.mxu1 %vm682_vm9, %v666_v41 }
  0xd0   : > { %v374_v44 = vpop.trf.xlu0 }
  0xd1   : > { %923 = vmatmul.msk.f32.gmra.mxu2 %vm387_vm4, %v374_v44  ;;  %935 = vmatmul.msk.f32.gmra.mxu3 %vm387_vm4, %v374_v44  ;;  %v536_v50 = vpop.trf.xlu1 }
  0xd2   : > { %989 = vmatmul.msk.f32.gmra.mxu0 %vm682_vm9, %v667_v43  ;;  %997 = vmatmul.msk.f32.gmra.mxu1 %vm682_vm9, %v667_v43 }
  0xd9   : > { %960 = vmatmul.msk.f32.vlgmr.msrb.gmra.mxu2 %vm387_vm4, %v533_v45  ;;  %972 = vmatmul.msk.f32.vlgmr.msrb.gmra.mxu3 %vm387_vm4, %v533_v45 }
  0xda   : > { %990 = vmatmul.msk.f32.gmra.mxu0 %vm682_vm9, %v668_v46  ;;  %998 = vmatmul.msk.f32.gmra.mxu1 %vm682_vm9, %v668_v46 }
  0xe1   : > { %961 = vmatmul.msk.f32.gmra.mxu2 %vm387_vm4, %v534_v47  ;;  %973 = vmatmul.msk.f32.gmra.mxu3 %vm387_vm4, %v534_v47 }
  0xe2   : > { %991 = vmatmul.msk.f32.gmra.mxu0 %vm682_vm9, %v669_v48  ;;  %999 = vmatmul.msk.f32.gmra.mxu1 %vm682_vm9, %v669_v48 }
  0xe9   : > { %962 = vmatmul.msk.f32.gmra.mxu2 %vm387_vm4, %v535_v49  ;;  %974 = vmatmul.msk.f32.gmra.mxu3 %vm387_vm4, %v535_v49 }
  0xf1   : > { %963 = vmatmul.msk.f32.gmra.mxu2 %vm387_vm4, %v536_v50  ;;  %975 = vmatmul.msk.f32.gmra.mxu3 %vm387_vm4, %v536_v50 }
 0x136   : > { %v417_v51 = vpop.f32.mrf.mxu0  ;;  %v446_v52 = vpop.f32.mrf.mxu1 }
 0x13e   : > { %v420_v55 = vpop.f32.mrf.mxu0  ;;  %v449_v56 = vpop.f32.mrf.mxu1 }
 0x147   : > { %v712_v59 = vpop.f32.mrf.mxu0  ;;  %v741_v60 = vpop.f32.mrf.mxu1 }
 0x14c   : > { %v423_v53 = vpop.f32.mrf.mxu2  ;;  %v452_v54 = vpop.f32.mrf.mxu3 }
 0x14f   : > { %v715_v63 = vpop.f32.mrf.mxu0  ;;  %v744_v0 = vpop.f32.mrf.mxu1 }
 0x154   : > { %v426_v57 = vpop.f32.mrf.mxu2  ;;  %v455_v58 = vpop.f32.mrf.mxu3 }
 0x157   : > { %v718_v3 = vpop.f32.mrf.mxu0  ;;  %v747_v4 = vpop.f32.mrf.mxu1 }
 0x15c   : > { %v578_v61 = vpop.f32.mrf.mxu2  ;;  %v607_v62 = vpop.f32.mrf.mxu3 }
 0x15d   : > { %v753_v9 = vmul.f32 %v578_v61, %v417_v51  ;;  %v754_v11 = vmul.f32 %v607_v62, %v446_v52 }
 0x15f   : > { %v761_v16 = vmul.f32 %v753_v9, %v712_v59  ;;  %v762_v17 = vmul.f32 %v754_v11, %v741_v60  ;;  %v721_v20 = vpop.f32.mrf.mxu0  ;;  %v750_v21 = vpop.f32.mrf.mxu1 }
 0x164   : > { %v581_v1 = vpop.f32.mrf.mxu2  ;;  %v610_v2 = vpop.f32.mrf.mxu3 }
 0x165   : > { %v755_v7 = vmul.f32 %v581_v1, %v420_v55  ;;  %v756_v8 = vmul.f32 %v610_v2, %v449_v56 }
 0x167   : > { %v763_v14 = vmul.f32 %v755_v7, %v715_v63  ;;  %v764_v15 = vmul.f32 %v756_v8, %v744_v0 }
 0x169   : > { %v769_v24 = vadd.f32 %v763_v14, %v761_v16  ;;  %v778_v25 = vadd.f32 %v764_v15, %v762_v17 }
 0x16c   : > { %v584_v5 = vpop.f32.mrf.mxu2  ;;  %v613_v6 = vpop.f32.mrf.mxu3 }
 0x16d   : > { %v757_v12 = vmul.f32 %v584_v5, %v423_v53  ;;  %v758_v13 = vmul.f32 %v613_v6, %v452_v54 }
 0x16f   : > { %v765_v18 = vmul.f32 %v757_v12, %v718_v3  ;;  %v766_v19 = vmul.f32 %v758_v13, %v747_v4 }
 0x171   : > { %v770_v28 = vadd.f32 %v769_v24, %v765_v18  ;;  %v779_v29 = vadd.f32 %v778_v25, %v766_v19 }
 0x174   : > { %v587_v22 = vpop.f32.mrf.mxu2  ;;  %v616_v23 = vpop.f32.mrf.mxu3 }
 0x175   : > { %v759_v26 = vmul.f32 %v587_v22, %v426_v57  ;;  %v760_v27 = vmul.f32 %v616_v23, %v455_v58 }
 0x177   : > { %v767_v30 = vmul.f32 %v759_v26, %v721_v20  ;;  %v768_v31 = vmul.f32 %v760_v27, %v750_v21 }
 0x179   : > { %v771_v32 = vadd.f32 %v770_v28, %v767_v30  ;;  %v780_v33 = vadd.f32 %v779_v29, %v768_v31 }
 0x17b   : > { %v772_v34 = vrot.slane %v771_v32, 4  ;;  %v781_v35 = vrot.slane %v780_v33, 4 }
 0x17d   : > { %v773_v36 = vadd.f32 %v772_v34, %v771_v32  ;;  %v782_v37 = vadd.f32 %v781_v35, %v780_v33 }
 0x17f   : > { %v774_v38 = vrot.slane %v773_v36, 2  ;;  %v783_v39 = vrot.slane %v782_v37, 2 }
 0x181   : > { %v775_v40 = vadd.f32 %v774_v38, %v773_v36  ;;  %v784_v41 = vadd.f32 %v783_v39, %v782_v37 }
 0x183   : > { %v776_v42 = vrot.slane %v775_v40, 1  ;;  %v785_v43 = vrot.slane %v784_v41, 1 }
 0x185   : > { %v786_v44 = vadd.f32 %v785_v43, %v784_v41  ;;  %v777_v45 = vadd.f32 %v776_v42, %v775_v40 }
 0x187   : > { %v789_v46 = vrot.slane %v786_v44, 7 }
 0x189   : > { %v791_v47 = vsel %vm790_vm10, %v777_v45, %v789_v46 }
 0x18a   : > { %797 = vst.msk [vmem:[%s271_s26] sm:$0x3] %vm795_vm11, %v791_v47 }
 0x18b   : > { %1088 = shalt.err (!%p1085_p3)
}
 0x18c   : > { %1020 = dma.vmem_to_hbm [thread:$0]  (%p1196_p5), %s812_s28, 32, %s814_s29, %s799_s9  }
 0x18d PF: > { %p1026_p4 = scmp.ge.s32.totalorder %s1123_s24, 2  ;;  %s825_s25 = sand.u32 1, %s1111_s21  }
 0x18e   : > { %s826_s16 = scalar_lea.sflag [#allocation3], %s825_s25 }
 0x18f   : > { %p1023_p7 = pnand %p1026_p4, %p1200_p6 }
 0x191   : > { %p1024_p8 = pneg %p1023_p7 }
 0x193   : > { %1106 = dma.done.wait (%p1024_p8), %s826_s16, 32  }
 0x194   : > { %1108 = vsyncadd (%p1024_p8), %s826_s16, 4294967264  ;;  %p16_p9 = scmp.ge.s32.totalorder %s1184_s27, 5   ;;  %s1568_s21 = smov %s1115_s22 }
 0x195   : > { %s1569_s22 = smov %s1119_s23  ;;  %s1570_s23 = smov %s1194_s30 }
 0x196   : > { %s1571_s24 = smov %s1184_s27  ;;  %18 = sbr.rel (!%p16_p9) target bundleno = 3 (0x3), region = 85 }
 0x19b   :  { %832 = vsyncpa [#allocation3], 1 }
 0x19c   :  { %834 = vsyncpa [#allocation3 + $0x1], 1 }

</bundles_post_ra>
